<compile_context>
chip_gen: v5e
topology: v5e:2x2
jax: 0.10.0
libtpu: 0.0.40
codegen_flags: <defaults>
</compile_context>

<pallas_src>
import functools
import math

import jax
import jax.numpy as jnp
from jax.experimental import pallas as pl
from jax.experimental.pallas import tpu as pltpu

_PI = math.pi


def _acos(x):
    """float32 arccos via Abramowitz & Stegun 4.4.45 (|err| <= ~2e-7).

    Only mul/add/sqrt/select, so it lowers cleanly on the TPU VPU and matches
    torch.acos to ~1e-7 on the clipped input range [-1+eps, 1-eps].
    """
    ax = jnp.abs(x)
    p = (((((((-0.0012624911 * ax + 0.0066700901) * ax - 0.0170881256) * ax
             + 0.0308918810) * ax - 0.0501743046) * ax + 0.0889789874) * ax
          - 0.2145988016) * ax + 1.5707963050)
    r = jnp.sqrt(jnp.maximum(1.0 - ax, 0.0)) * p
    return jnp.where(x < 0.0, jnp.float32(_PI) - r, r)


def _token_guide_kernel(m1_ref, m2_ref, cont_ref, dir_ref, out_ref,
                        *, eps, alpha, region_num):
    B = m1_ref.shape[0]
    R = dir_ref.shape[1]

    m1 = m1_ref[...]                       # (B, 9)  gt rotation (row-major flat)
    m2 = m2_ref[...]                       # (B, 9)  predicted rotation
    pitch = cont_ref[:, 0:1]               # (B, 1)  degrees
    yaw = cont_ref[:, 1:2]                 # (B, 1)  degrees

    # --- per-region geodesic traces: trace(m1 @ d_r^T) == sum(m1 * d_r) -------
    dirs = dir_ref[...]                    # (B, R, 9)
    t = jnp.sum(m1[:, None, :] * dirs, axis=-1)            # (B, R) traces

    # --- region selection (TokenGuideLoss.Identity) ---------------------------
    ylow = yaw < -40.0
    ymid = jnp.logical_and(yaw >= -40.0, yaw <= 40.0)
    yhigh = yaw > 40.0
    plow = pitch < -30.0
    pmid = jnp.logical_and(pitch >= -30.0, pitch <= 30.0)
    phigh = pitch > 30.0

    if region_num == 9:
        conds = [
            (yhigh & phigh, 0), (ymid & phigh, 1), (ylow & phigh, 2),
            (yhigh & pmid, 3), (ymid & pmid, 4), (ylow & pmid, 5),
            (yhigh & plow, 6), (ymid & plow, 7), (ylow & plow, 8),
        ]
    else:  # region_num == 11
        conds = [
            (yhigh & phigh, 0), (ymid & phigh, 1), (ylow & phigh, 2),
            ((yaw > 60.0) & pmid, 3),
            ((yaw > 20.0) & (yaw <= 60.0) & pmid, 4),
            ((yaw >= -20.0) & (yaw <= 20.0) & pmid, 5),
            ((yaw >= -60.0) & (yaw < -20.0) & pmid, 6),
            ((yaw < -60.0) & pmid, 7),
            (yhigh & plow, 8), (ymid & plow, 9), (ylow & plow, 10),
        ]

    # Conditions are mutually exclusive; unmatched (e.g. NaN angles) falls back
    # to the last region, matching torch's all_regions[-1] for flag == -1.
    rgn_trace = t[:, R - 1:R]                               # (B, 1)
    for cond, val in conds:
        rgn_trace = jnp.where(cond, t[:, val:val + 1], rgn_trace)

    our_trace = jnp.sum(t, axis=-1, keepdims=True) * (1.0 / R)   # mean-region trace

    # --- geodesic cosines ------------------------------------------------------
    sum_mm = jnp.sum(m1 * m2, axis=-1, keepdims=True)        # reused for cos_sim
    cos_pred = (sum_mm - 1.0) * 0.5
    cos_ori = (rgn_trace - 1.0) * 0.5
    cos_our = (our_trace - 1.0) * 0.5

    # --- batch cosine similarity (F.cosine_similarity: per-norm clamp) --------
    n1 = jnp.maximum(jnp.sqrt(jnp.sum(m1 * m1, axis=-1, keepdims=True)), 1e-8)
    n2 = jnp.maximum(jnp.sqrt(jnp.sum(m2 * m2, axis=-1, keepdims=True)), 1e-8)
    cos_sim = sum_mm / (n1 * n2)

    # --- one clipped acos over all four angle columns --------------------------
    cos_all = jnp.concatenate([cos_pred, cos_ori, cos_sim, cos_our], axis=-1)
    th = _acos(jnp.clip(cos_all, -1.0 + eps, 1.0 - eps))     # (B, 4)

    # --- single batch mean + weighted combo + single aligned store -------------
    means = jnp.sum(th, axis=0, keepdims=True) * (1.0 / B)   # (1, 4): pred, ori, pre, our
    pred_m = means[:, 0:1]
    ori_m = means[:, 1:2]
    pre_m = means[:, 2:3]
    our_m = means[:, 3:4]
    overall = (alpha * pred_m + (1.0 - alpha) * ori_m
               + 0.1 * pre_m + 0.1 * our_m)

    # Lane-dense (1, 128) output -> unmasked vst.
    out_ref[...] = jnp.concatenate(
        [overall, means, jnp.zeros((1, 123), jnp.float32)], axis=-1)


@functools.partial(jax.jit, static_argnames=("eps", "alpha", "region_num"))
def token_guide_loss(m1, m2, cont_labels, dir_9_d,
                     eps=1e-7, alpha=0.6, region_num=9):
    """JAX/Pallas equivalent of TokenGuideLoss.forward.

    m1, m2:      (B, 3, 3)    gt / predicted rotation matrices
    cont_labels: (B, C)       gt Euler angles, [:,0]=pitch, [:,1]=yaw (degrees)
    dir_9_d:     (B, R, 3, 3) predicted rotation matrix for each region
    Returns (overall_loss, pred_loss, ori_loss, pre_loss, our_loss) scalars.
    """
    assert region_num in (9, 11), "Region number should be 9 or 11."
    B = m1.shape[0]
    R = dir_9_d.shape[1]
    assert R == region_num
    assert cont_labels.shape[1] >= 2

    # Contiguous reshapes / casts only — no transpose, no concatenate, no extra
    # HBM round trip.  Everything fuses inside this jit up to the pallas_call.
    m1f = m1.reshape(B, 9).astype(jnp.float32)
    m2f = m2.reshape(B, 9).astype(jnp.float32)
    contf = cont_labels.astype(jnp.float32)
    dirsf = dir_9_d.reshape(B, R, 9).astype(jnp.float32)

    kernel = functools.partial(
        _token_guide_kernel, eps=eps, alpha=alpha, region_num=region_num)

    # Grid-less single-block call: four tiny VMEM operands, one (1,128) output.
    # TODO(synk): if B ever scales into the thousands, add a grid over B with a
    # small (1,4) partial-sum accumulator (reduction axis "arbitrary") and set
    # vmem_limit_bytes, so the single-block layout does not hit the scoped VMEM
    # limit on v5e (16 MiB default) / v7x (32 MiB default, 64 MiB physical).
    res = pl.pallas_call(
        kernel,
        out_shape=jax.ShapeDtypeStruct((1, 128), jnp.float32),
        in_specs=[pl.BlockSpec(memory_space=pltpu.MemorySpace.VMEM)] * 4,
        out_specs=pl.BlockSpec(memory_space=pltpu.MemorySpace.VMEM),
    )(m1f, m2f, contf, dirsf)

    overall = res[0, 0]
    pred_loss = res[0, 1]
    ori_loss = res[0, 2]
    pre_loss = res[0, 3]
    our_loss = res[0, 4]
    return overall, pred_loss, ori_loss, pre_loss, our_loss


if __name__ == "__main__":
    key = jax.random.PRNGKey(0)
    B, R = 8, 9
    k1, k2, k3, k4 = jax.random.split(key, 4)

    def random_rotations(k, prefix):
        a = jax.random.normal(k, prefix + (3, 3), dtype=jnp.float32)
        q, _ = jnp.linalg.qr(a)          # orthonormal 3x3 per leading index
        return q.astype(jnp.float32)

    m1 = random_rotations(k1, (B,))                 # (B, 3, 3)
    m2 = random_rotations(k2, (B,))                 # (B, 3, 3)
    dir_9_d = random_rotations(k3, (B, R))          # (B, R, 3, 3)
    cont_labels = jax.random.uniform(
        k4, (B, 3), minval=-90.0, maxval=90.0, dtype=jnp.float32)

    outs = token_guide_loss(m1, m2, cont_labels, dir_9_d)
    outs = jax.block_until_ready(outs)
    print("KERNEL_OK")
</pallas_src>

<mosaic_0001>
module attributes {stable_mosaic.version = 11 : i64} {
  func.func @_token_guide_kernel(%arg0: memref<8x9xf32, #tpu.memory_space<vmem>>, %arg1: memref<8x9xf32, #tpu.memory_space<vmem>>, %arg2: memref<8x3xf32, #tpu.memory_space<vmem>>, %arg3: memref<8x9x9xf32, #tpu.memory_space<vmem>>, %arg4: memref<1x128xf32, #tpu.memory_space<vmem>>) attributes {dimension_semantics = [], scalar_prefetch = 0 : i64, scratch_operands = 0 : i64, tpu.core_type = #tpu.core_type<tc>} {
    %c0 = arith.constant 0 : index
    %c0_0 = arith.constant 0 : index
    %0 = vector.load %arg0[%c0, %c0_0] : memref<8x9xf32, #tpu.memory_space<vmem>>, vector<8x9xf32>
    %c0_1 = arith.constant 0 : index
    %c0_2 = arith.constant 0 : index
    %1 = vector.load %arg1[%c0_1, %c0_2] : memref<8x9xf32, #tpu.memory_space<vmem>>, vector<8x9xf32>
    %c0_3 = arith.constant 0 : index
    %c0_4 = arith.constant 0 : index
    %2 = vector.load %arg2[%c0_3, %c0_4] : memref<8x3xf32, #tpu.memory_space<vmem>>, vector<8x1xf32>
    %c0_5 = arith.constant 0 : index
    %c1 = arith.constant 1 : index
    %3 = vector.load %arg2[%c0_5, %c1] : memref<8x3xf32, #tpu.memory_space<vmem>>, vector<8x1xf32>
    %c0_6 = arith.constant 0 : index
    %c0_7 = arith.constant 0 : index
    %c0_8 = arith.constant 0 : index
    %4 = vector.load %arg3[%c0_6, %c0_7, %c0_8] : memref<8x9x9xf32, #tpu.memory_space<vmem>>, vector<8x9x9xf32>
    %5 = vector.shape_cast %0 : vector<8x9xf32> to vector<8x1x9xf32>
    %6 = vector.broadcast %5 : vector<8x1x9xf32> to vector<8x9x9xf32>
    %7 = arith.mulf %6, %4 : vector<8x9x9xf32>
    %cst = arith.constant dense<0.000000e+00> : vector<8x9xf32>
    %8 = vector.multi_reduction <add>, %7, %cst [2] : vector<8x9x9xf32> to vector<8x9xf32>
    %cst_9 = arith.constant -4.000000e+01 : f32
    %9 = vector.broadcast %cst_9 : f32 to vector<8x1xf32>
    %10 = arith.cmpf olt, %3, %9 : vector<8x1xf32>
    %cst_10 = arith.constant -4.000000e+01 : f32
    %11 = vector.broadcast %cst_10 : f32 to vector<8x1xf32>
    %12 = arith.cmpf oge, %3, %11 : vector<8x1xf32>
    %cst_11 = arith.constant 4.000000e+01 : f32
    %13 = vector.broadcast %cst_11 : f32 to vector<8x1xf32>
    %14 = arith.cmpf ole, %3, %13 : vector<8x1xf32>
    %15 = arith.andi %12, %14 : vector<8x1xi1>
    %cst_12 = arith.constant 4.000000e+01 : f32
    %16 = vector.broadcast %cst_12 : f32 to vector<8x1xf32>
    %17 = arith.cmpf ogt, %3, %16 : vector<8x1xf32>
    %cst_13 = arith.constant -3.000000e+01 : f32
    %18 = vector.broadcast %cst_13 : f32 to vector<8x1xf32>
    %19 = arith.cmpf olt, %2, %18 : vector<8x1xf32>
    %cst_14 = arith.constant -3.000000e+01 : f32
    %20 = vector.broadcast %cst_14 : f32 to vector<8x1xf32>
    %21 = arith.cmpf oge, %2, %20 : vector<8x1xf32>
    %cst_15 = arith.constant 3.000000e+01 : f32
    %22 = vector.broadcast %cst_15 : f32 to vector<8x1xf32>
    %23 = arith.cmpf ole, %2, %22 : vector<8x1xf32>
    %24 = arith.andi %21, %23 : vector<8x1xi1>
    %cst_16 = arith.constant 3.000000e+01 : f32
    %25 = vector.broadcast %cst_16 : f32 to vector<8x1xf32>
    %26 = arith.cmpf ogt, %2, %25 : vector<8x1xf32>
    %27 = arith.andi %17, %26 : vector<8x1xi1>
    %28 = arith.andi %15, %26 : vector<8x1xi1>
    %29 = arith.andi %10, %26 : vector<8x1xi1>
    %30 = arith.andi %17, %24 : vector<8x1xi1>
    %31 = arith.andi %15, %24 : vector<8x1xi1>
    %32 = arith.andi %10, %24 : vector<8x1xi1>
    %33 = arith.andi %17, %19 : vector<8x1xi1>
    %34 = arith.andi %15, %19 : vector<8x1xi1>
    %35 = arith.andi %10, %19 : vector<8x1xi1>
    %36 = vector.extract_strided_slice %8 {offsets = [0, 8], sizes = [8, 1], strides = [1, 1]} : vector<8x9xf32> to vector<8x1xf32>
    %37 = vector.extract_strided_slice %8 {offsets = [0, 0], sizes = [8, 1], strides = [1, 1]} : vector<8x9xf32> to vector<8x1xf32>
    %38 = arith.select %27, %37, %36 : vector<8x1xi1>, vector<8x1xf32>
    %39 = vector.extract_strided_slice %8 {offsets = [0, 1], sizes = [8, 1], strides = [1, 1]} : vector<8x9xf32> to vector<8x1xf32>
    %40 = arith.select %28, %39, %38 : vector<8x1xi1>, vector<8x1xf32>
    %41 = vector.extract_strided_slice %8 {offsets = [0, 2], sizes = [8, 1], strides = [1, 1]} : vector<8x9xf32> to vector<8x1xf32>
    %42 = arith.select %29, %41, %40 : vector<8x1xi1>, vector<8x1xf32>
    %43 = vector.extract_strided_slice %8 {offsets = [0, 3], sizes = [8, 1], strides = [1, 1]} : vector<8x9xf32> to vector<8x1xf32>
    %44 = arith.select %30, %43, %42 : vector<8x1xi1>, vector<8x1xf32>
    %45 = vector.extract_strided_slice %8 {offsets = [0, 4], sizes = [8, 1], strides = [1, 1]} : vector<8x9xf32> to vector<8x1xf32>
    %46 = arith.select %31, %45, %44 : vector<8x1xi1>, vector<8x1xf32>
    %47 = vector.extract_strided_slice %8 {offsets = [0, 5], sizes = [8, 1], strides = [1, 1]} : vector<8x9xf32> to vector<8x1xf32>
    %48 = arith.select %32, %47, %46 : vector<8x1xi1>, vector<8x1xf32>
    %49 = vector.extract_strided_slice %8 {offsets = [0, 6], sizes = [8, 1], strides = [1, 1]} : vector<8x9xf32> to vector<8x1xf32>
    %50 = arith.select %33, %49, %48 : vector<8x1xi1>, vector<8x1xf32>
    %51 = vector.extract_strided_slice %8 {offsets = [0, 7], sizes = [8, 1], strides = [1, 1]} : vector<8x9xf32> to vector<8x1xf32>
    %52 = arith.select %34, %51, %50 : vector<8x1xi1>, vector<8x1xf32>
    %53 = vector.extract_strided_slice %8 {offsets = [0, 8], sizes = [8, 1], strides = [1, 1]} : vector<8x9xf32> to vector<8x1xf32>
    %54 = arith.select %35, %53, %52 : vector<8x1xi1>, vector<8x1xf32>
    %cst_17 = arith.constant dense<0.000000e+00> : vector<8xf32>
    %55 = vector.multi_reduction <add>, %8, %cst_17 [1] : vector<8x9xf32> to vector<8xf32>
    %56 = vector.shape_cast %55 : vector<8xf32> to vector<8x1xf32>
    %cst_18 = arith.constant 0.111111112 : f32
    %57 = vector.broadcast %cst_18 : f32 to vector<8x1xf32>
    %58 = arith.mulf %56, %57 : vector<8x1xf32>
    %59 = arith.mulf %0, %1 : vector<8x9xf32>
    %cst_19 = arith.constant dense<0.000000e+00> : vector<8xf32>
    %60 = vector.multi_reduction <add>, %59, %cst_19 [1] : vector<8x9xf32> to vector<8xf32>
    %61 = vector.shape_cast %60 : vector<8xf32> to vector<8x1xf32>
    %cst_20 = arith.constant 1.000000e+00 : f32
    %62 = vector.broadcast %cst_20 : f32 to vector<8x1xf32>
    %63 = arith.subf %61, %62 : vector<8x1xf32>
    %cst_21 = arith.constant 5.000000e-01 : f32
    %64 = vector.broadcast %cst_21 : f32 to vector<8x1xf32>
    %65 = arith.mulf %63, %64 : vector<8x1xf32>
    %cst_22 = arith.constant 1.000000e+00 : f32
    %66 = vector.broadcast %cst_22 : f32 to vector<8x1xf32>
    %67 = arith.subf %54, %66 : vector<8x1xf32>
    %cst_23 = arith.constant 5.000000e-01 : f32
    %68 = vector.broadcast %cst_23 : f32 to vector<8x1xf32>
    %69 = arith.mulf %67, %68 : vector<8x1xf32>
    %cst_24 = arith.constant 1.000000e+00 : f32
    %70 = vector.broadcast %cst_24 : f32 to vector<8x1xf32>
    %71 = arith.subf %58, %70 : vector<8x1xf32>
    %cst_25 = arith.constant 5.000000e-01 : f32
    %72 = vector.broadcast %cst_25 : f32 to vector<8x1xf32>
    %73 = arith.mulf %71, %72 : vector<8x1xf32>
    %74 = arith.mulf %0, %0 : vector<8x9xf32>
    %cst_26 = arith.constant dense<0.000000e+00> : vector<8xf32>
    %75 = vector.multi_reduction <add>, %74, %cst_26 [1] : vector<8x9xf32> to vector<8xf32>
    %76 = vector.shape_cast %75 : vector<8xf32> to vector<8x1xf32>
    %77 = math.sqrt %76 : vector<8x1xf32>
    %cst_27 = arith.constant 9.99999993E-9 : f32
    %78 = vector.broadcast %cst_27 : f32 to vector<8x1xf32>
    %79 = arith.maximumf %77, %78 : vector<8x1xf32>
    %80 = arith.mulf %1, %1 : vector<8x9xf32>
    %cst_28 = arith.constant dense<0.000000e+00> : vector<8xf32>
    %81 = vector.multi_reduction <add>, %80, %cst_28 [1] : vector<8x9xf32> to vector<8xf32>
    %82 = vector.shape_cast %81 : vector<8xf32> to vector<8x1xf32>
    %83 = math.sqrt %82 : vector<8x1xf32>
    %cst_29 = arith.constant 9.99999993E-9 : f32
    %84 = vector.broadcast %cst_29 : f32 to vector<8x1xf32>
    %85 = arith.maximumf %83, %84 : vector<8x1xf32>
    %86 = arith.mulf %79, %85 : vector<8x1xf32>
    %87 = arith.divf %61, %86 : vector<8x1xf32>
    %88 = tpu.concatenate %65, %69, %87, %73 in 1 : vector<8x1xf32>, vector<8x1xf32>, vector<8x1xf32>, vector<8x1xf32> -> vector<8x4xf32>
    %cst_30 = arith.constant -0.99999988 : f32
    %cst_31 = arith.constant 0.99999988 : f32
    %89 = vector.broadcast %cst_30 : f32 to vector<8x4xf32>
    %90 = arith.maximumf %89, %88 : vector<8x4xf32>
    %91 = vector.broadcast %cst_31 : f32 to vector<8x4xf32>
    %92 = arith.minimumf %91, %90 : vector<8x4xf32>
    %93 = math.absf %92 : vector<8x4xf32>
    %cst_32 = arith.constant -0.0012624911 : f32
    %94 = vector.broadcast %cst_32 : f32 to vector<8x4xf32>
    %95 = arith.mulf %94, %93 : vector<8x4xf32>
    %cst_33 = arith.constant 6.670090e-03 : f32
    %96 = vector.broadcast %cst_33 : f32 to vector<8x4xf32>
    %97 = arith.addf %95, %96 : vector<8x4xf32>
    %98 = arith.mulf %97, %93 : vector<8x4xf32>
    %cst_34 = arith.constant 0.0170881264 : f32
    %99 = vector.broadcast %cst_34 : f32 to vector<8x4xf32>
    %100 = arith.subf %98, %99 : vector<8x4xf32>
    %101 = arith.mulf %100, %93 : vector<8x4xf32>
    %cst_35 = arith.constant 0.0308918804 : f32
    %102 = vector.broadcast %cst_35 : f32 to vector<8x4xf32>
    %103 = arith.addf %101, %102 : vector<8x4xf32>
    %104 = arith.mulf %103, %93 : vector<8x4xf32>
    %cst_36 = arith.constant 0.0501743034 : f32
    %105 = vector.broadcast %cst_36 : f32 to vector<8x4xf32>
    %106 = arith.subf %104, %105 : vector<8x4xf32>
    %107 = arith.mulf %106, %93 : vector<8x4xf32>
    %cst_37 = arith.constant 0.0889789909 : f32
    %108 = vector.broadcast %cst_37 : f32 to vector<8x4xf32>
    %109 = arith.addf %107, %108 : vector<8x4xf32>
    %110 = arith.mulf %109, %93 : vector<8x4xf32>
    %cst_38 = arith.constant 0.214598805 : f32
    %111 = vector.broadcast %cst_38 : f32 to vector<8x4xf32>
    %112 = arith.subf %110, %111 : vector<8x4xf32>
    %113 = arith.mulf %112, %93 : vector<8x4xf32>
    %cst_39 = arith.constant 1.57079625 : f32
    %114 = vector.broadcast %cst_39 : f32 to vector<8x4xf32>
    %115 = arith.addf %113, %114 : vector<8x4xf32>
    %cst_40 = arith.constant 1.000000e+00 : f32
    %116 = vector.broadcast %cst_40 : f32 to vector<8x4xf32>
    %117 = arith.subf %116, %93 : vector<8x4xf32>
    %cst_41 = arith.constant 0.000000e+00 : f32
    %118 = vector.broadcast %cst_41 : f32 to vector<8x4xf32>
    %119 = arith.maximumf %117, %118 : vector<8x4xf32>
    %120 = math.sqrt %119 : vector<8x4xf32>
    %121 = arith.mulf %120, %115 : vector<8x4xf32>
    %cst_42 = arith.constant 0.000000e+00 : f32
    %122 = vector.broadcast %cst_42 : f32 to vector<8x4xf32>
    %123 = arith.cmpf olt, %92, %122 : vector<8x4xf32>
    %cst_43 = arith.constant 3.14159274 : f32
    %124 = vector.broadcast %cst_43 : f32 to vector<8x4xf32>
    %125 = arith.subf %124, %121 : vector<8x4xf32>
    %126 = arith.select %123, %125, %121 : vector<8x4xi1>, vector<8x4xf32>
    %cst_44 = arith.constant dense<0.000000e+00> : vector<4xf32>
    %127 = vector.multi_reduction <add>, %126, %cst_44 [0] : vector<8x4xf32> to vector<4xf32>
    %128 = vector.shape_cast %127 : vector<4xf32> to vector<1x4xf32>
    %cst_45 = arith.constant 1.250000e-01 : f32
    %129 = vector.broadcast %cst_45 : f32 to vector<1x4xf32>
    %130 = arith.mulf %128, %129 : vector<1x4xf32>
    %131 = vector.extract_strided_slice %130 {offsets = [0, 0], sizes = [1, 1], strides = [1, 1]} : vector<1x4xf32> to vector<1x1xf32>
    %132 = vector.extract_strided_slice %130 {offsets = [0, 1], sizes = [1, 1], strides = [1, 1]} : vector<1x4xf32> to vector<1x1xf32>
    %133 = vector.extract_strided_slice %130 {offsets = [0, 2], sizes = [1, 1], strides = [1, 1]} : vector<1x4xf32> to vector<1x1xf32>
    %134 = vector.extract_strided_slice %130 {offsets = [0, 3], sizes = [1, 1], strides = [1, 1]} : vector<1x4xf32> to vector<1x1xf32>
    %cst_46 = arith.constant 6.000000e-01 : f32
    %135 = vector.broadcast %cst_46 : f32 to vector<1x1xf32>
    %136 = arith.mulf %135, %131 : vector<1x1xf32>
    %cst_47 = arith.constant 4.000000e-01 : f32
    %137 = vector.broadcast %cst_47 : f32 to vector<1x1xf32>
    %138 = arith.mulf %137, %132 : vector<1x1xf32>
    %139 = arith.addf %136, %138 : vector<1x1xf32>
    %cst_48 = arith.constant 1.000000e-01 : f32
    %140 = vector.broadcast %cst_48 : f32 to vector<1x1xf32>
    %141 = arith.mulf %140, %133 : vector<1x1xf32>
    %142 = arith.addf %139, %141 : vector<1x1xf32>
    %cst_49 = arith.constant 1.000000e-01 : f32
    %143 = vector.broadcast %cst_49 : f32 to vector<1x1xf32>
    %144 = arith.mulf %143, %134 : vector<1x1xf32>
    %145 = arith.addf %142, %144 : vector<1x1xf32>
    %cst_50 = arith.constant 0.000000e+00 : f32
    %146 = vector.broadcast %cst_50 : f32 to vector<1x123xf32>
    %147 = tpu.concatenate %145, %130, %146 in 1 : vector<1x1xf32>, vector<1x4xf32>, vector<1x123xf32> -> vector<1x128xf32>
    %c0_51 = arith.constant 0 : index
    %c0_52 = arith.constant 0 : index
    %148 = vector.load %arg4[%c0_51, %c0_52] : memref<1x128xf32, #tpu.memory_space<vmem>>, vector<1x128xf32>
    tpu.vector_store %arg4[%c0_51, %c0_52], %147 {strides = array<i32>} : memref<1x128xf32, #tpu.memory_space<vmem>>, vector<1x128xf32>,
    return
  }
}

</mosaic_0001>

<bundles_post_ra>
// kernel: token_guide_loss.1
= control target key start
LH: loop header
LB: loop body
LE: loop exit
PB: predicated region body
PF: predicated region fallthrough
CT: control target
= control target key end

     0   :  { %vm76_vm0 = vcmask 72704   ;;  %vm80_vm1 = vcmask 65536   ;;  %s524_s23 = smov 1   ;;  %vm166_vm7 = vcmask 1041409   ;;  %vm169_vm8 = vcmask 1042434   ;;  %s526_s24 = smov 126   ;;  %s829_s0 = inlined_call_operand.vmem [shape: f32[8,9], index: 0, kind: input, shape index: {}]   ;;  %s830_s3 = inlined_call_operand.vmem [shape: f32[8,9,9], index: 3, kind: input, shape index: {}]   ;;  %s831_s1 = inlined_call_operand.vmem [shape: f32[8,9], index: 1, kind: input, shape index: {}]   ;;  %s832_s2 = inlined_call_operand.vmem [shape: f32[8,3], index: 2, kind: input, shape index: {}]   ;;  %s833_s4 = inlined_call_operand.vmem [shape: f32[1,128], index: 4, kind: output, shape index: {}]  }
   0x1   :  { %v556_v0 = vld [vmem:[%s829_s0] sm:$0xff]  ;;  %v22_v6 = vld [vmem:[%s830_s3 + $0x10] sm:$0xff]  ;;  %v21_v10 = vld [vmem:[%s830_s3 + $0x8] sm:$0x1]  ;;  %vm329_vm9 = vcmask 130112   ;;  %vm172_vm10 = vcmask 1043459  }
   0x2   :  { %v20_v1 = vld [vmem:[%s830_s3] sm:$0xff]  ;;  %v44_v2 = vperm.slane %v556_v0, 0  ;;  %v38_v3 = vrot.slane %v556_v0, 2  ;;  %v37_v4 = vrot.slane %v556_v0, 1  ;;  %v25_v14 = vld [vmem:[%s830_s3 + $0x28] sm:$0x1] }
   0x3   :  { %v24_v5 = vld [vmem:[%s830_s3 + $0x20] sm:$0xff]  ;;  %v23_v15 = vld [vmem:[%s830_s3 + $0x18] sm:$0x1]  ;;  %v39_v19 = vrot.slane %v556_v0, 3  ;;  %v40_v22 = vrot.slane %v556_v0, 4  ;;  %v26_v25 = vld [vmem:[%s830_s3 + $0x30] sm:$0xff] }
   0x4   :  { %v60_v7 = vmul.f32 %v44_v2, %v20_v1  ;;  %v46_v8 = vperm.slane %v38_v3, 0  ;;  %v45_v9 = vperm.slane %v37_v4, 0  ;;  %v61_v18 = vmul.f32 %v44_v2, %v21_v10  ;;  %v28_v29 = vld [vmem:[%s830_s3 + $0x40] sm:$0xff]  ;;  %v27_v30 = vld [vmem:[%s830_s3 + $0x38] sm:$0x1]  ;;  %v30_v41 = vld [vmem:[%s830_s3 + $0x50] sm:$0xff] }
   0x5   :  { %v47_v24 = vperm.slane %v39_v19, 0  ;;  %v48_v28 = vperm.slane %v40_v22, 0  ;;  %v41_v34 = vrot.slane %v556_v0, 5  ;;  %v29_v36 = vld [vmem:[%s830_s3 + $0x48] sm:$0x1]  ;;  %v42_v43 = vrot.slane %v556_v0, 6 }
   0x6   :  { %v77_v11 = vsel %vm76_vm0, %v60_v7, 0.0  ;;  %v64_v12 = vmul.f32 %v46_v8, %v24_v5  ;;  %v62_v13 = vmul.f32 %v45_v9, %v22_v6  ;;  %v65_v20 = vmul.f32 %v46_v8, %v25_v14  ;;  %v31_v40 = vld [vmem:[%s830_s3 + $0x58] sm:$0x1]  ;;  %v32_v49 = vld [vmem:[%s830_s3 + $0x60] sm:$0xff]  ;;  %v34_v53 = vld [vmem:[%s830_s3 + $0x70] sm:$0xff]  ;;  %s527_s25 = smov 125  }
   0x7   :  { %78 = vadd.xlane.f32.xlu0 %v77_v11  ;;  %v63_v21 = vmul.f32 %v45_v9, %v23_v15  ;;  %v81_v23 = vsel %vm80_vm1, %v61_v18, 0.0  ;;  %v66_v31 = vmul.f32 %v47_v24, %v26_v25  ;;  %v68_v32 = vmul.f32 %v48_v28, %v28_v29  ;;  %v33_v54 = vld [vmem:[%s830_s3 + $0x68] sm:$0x1]  ;;  %v35_v59 = vld [vmem:[%s830_s3 + $0x78] sm:$0x1]  ;;  %v18_v62 = vld [vmem:[%s831_s1] sm:$0xff] }
   0x8   :  { %v90_v16 = vsel %vm76_vm0, %v64_v12, 0.0  ;;  %v84_v17 = vsel %vm76_vm0, %v62_v13, 0.0  ;;  %v93_v26 = vsel %vm80_vm1, %v65_v20, 0.0  ;;  %v67_v33 = vmul.f32 %v47_v24, %v27_v30  ;;  %v641_v7 = vld [vmem:[%s832_s2] sm:$0xff]  ;;  %s525_s2 = smov 127  }
   0x9   :  { %91 = vadd.xlane.f32.xlu2 %v90_v16  ;;  %85 = vadd.xlane.f32.xlu1 %v84_v17  ;;  %v87_v27 = vsel %vm80_vm1, %v63_v21, 0.0  ;;  %v96_v35 = vsel %vm76_vm0, %v66_v31, 0.0  ;;  %v102_v37 = vsel %vm76_vm0, %v68_v32, 0.0  ;;  %v49_v39 = vperm.slane %v41_v34, 0 }
   0xa   :  { %v99_v38 = vsel %vm80_vm1, %v67_v33, 0.0  ;;  %v69_v42 = vmul.f32 %v48_v28, %v29_v36  ;;  %v43_v46 = vrot.slane %v556_v0, 7  ;;  %v50_v48 = vperm.slane %v42_v43, 0 }
   0xb   :  { %v71_v44 = vmul.f32 %v49_v39, %v31_v40  ;;  %v70_v45 = vmul.f32 %v49_v39, %v30_v41  ;;  %v391_v1 = vmul.f32 %v18_v62, %v18_v62  ;;  %v374_v2 = vmul.f32 %v556_v0, %v556_v0 }
   0xc   :  { %v105_v47 = vsel %vm80_vm1, %v69_v42, 0.0  ;;  %v51_v52 = vperm.slane %v43_v46, 0  ;;  %v72_v55 = vmul.f32 %v50_v48, %v32_v49  ;;  %v73_v57 = vmul.f32 %v50_v48, %v33_v54 }
   0xd   :  { %v111_v50 = vsel %vm80_vm1, %v71_v44, 0.0  ;;  %v108_v51 = vsel %vm76_vm0, %v70_v45, 0.0  ;;  %v364_v3 = vmul.f32 %v18_v62, %v556_v0  ;;  %v392_v5 = vsel %vm76_vm0, %v391_v1, 0.0 }
   0xe   :  { %v74_v56 = vmul.f32 %v51_v52, %v34_v53  ;;  %v114_v58 = vsel %vm76_vm0, %v72_v55, 0.0  ;;  %v117_v61 = vsel %vm80_vm1, %v73_v57, 0.0  ;;  %v75_v63 = vmul.f32 %v51_v52, %v35_v59 }
   0xf   :  { %82 = vadd.xlane.f32.xlu0 %v81_v23  ;;  %v375_v6 = vsel %vm76_vm0, %v374_v2, 0.0  ;;  %vm135_vm2 = vcmp.gt.f32.partialorder %v641_v7, 30.0  ;;  %v523_v8 = vmov 0   ;;  %vm132_vm3 = vcmp.ge.f32.partialorder %v641_v7, -30.0 }
  0x10   :  { %v120_v60 = vsel %vm76_vm0, %v74_v56, 0.0  ;;  %v123_v4 = vsel %vm80_vm1, %v75_v63, 0.0  ;;  %v136_v9 = vsel %vm135_vm2, 1, %v523_v8  ;;  %vm133_vm4 = vcmp.le.f32.partialorder %v641_v7, 30.0 }
  0x11   :  { %94 = vadd.xlane.f32.xlu2 %v93_v26  ;;  %88 = vadd.xlane.f32.xlu1 %v87_v27  ;;  %vm131_vm5 = vcmp.lt.f32.partialorder %v641_v7, -30.0  ;;  %vm134_vm6 = vmand %vm132_vm3, %vm133_vm4  ;;  %v365_v11 = vsel %vm76_vm0, %v364_v3, 0.0  ;;  %v324_v12 = vlaneseq  ;;  %vm175_vm11 = vcmask 1044484  }
  0x12   :  { %v150_v0 = vsel %vm131_vm5, 1, %v523_v8  ;;  %v143_v10 = vsel %vm134_vm6, 1, %v523_v8  ;;  %vm178_vm12 = vcmask 1045509   ;;  %vm181_vm13 = vcmask 1046534  }
  0x13   :  { %v653_v14 = vand.u32 127, %v324_v12  ;;  %vm184_vm14 = vcmask 1047559   ;;  %vm127_vm15 = vcmp.ge.f32.partialorder %v641_v7, -40.0  ;;  %vm128_vm1 = vcmp.le.f32.partialorder %v641_v7, 40.0 }
  0x14   :  { %vm130_vm2 = vcmp.gt.f32.partialorder %v641_v7, 40.0  ;;  %vm126_vm3 = vcmp.lt.f32.partialorder %v641_v7, -40.0 }
  0x15   :  { %v673_v45 = vadd.s32 4294967288, %v653_v14 }
  0x17   :  { %97 = vadd.xlane.f32.xlu0 %v96_v35 }
  0x19   :  { %103 = vadd.xlane.f32.xlu2 %v102_v37  ;;  %100 = vadd.xlane.f32.xlu1 %v99_v38 }
  0x1f   :  { %106 = vadd.xlane.f32.xlu0 %v105_v47 }
  0x21   :  { %112 = vadd.xlane.f32.xlu2 %v111_v50  ;;  %109 = vadd.xlane.f32.xlu1 %v108_v51 }
  0x27   :  { %115 = vadd.xlane.f32.xlu0 %v114_v58 }
  0x29   :  { %121 = vadd.xlane.f32.xlu2 %v120_v60  ;;  %118 = vadd.xlane.f32.xlu1 %v117_v61 }
  0x2f   :  { %124 = vadd.xlane.f32.xlu0 %v123_v4 }
  0x31   :  { %393 = vadd.xlane.f32.xlu2 %v392_v5  ;;  %376 = vadd.xlane.f32.xlu1 %v375_v6 }
  0x43   :  { %137 = vrot.lane.b32.xlu0 %v136_v9, %s524_s23 }
  0x49   :  { %151 = vrot.lane.b32.xlu2 %v150_v0, %s524_s23 }
  0x4a   :  { %144 = vrot.lane.b32.xlu1 %v143_v10, %s524_s23 }
  0x72   :  { %366 = vadd.xlane.f32.xlu2 %v365_v11 }
  0x7a   :  { %v651_v13 = vpop.xlane.xlu0 %78 }
  0x7b   :  { %v211_v15 = vrot.slane %v651_v13, 1  ;;  %v227_v16 = vrot.slane %v651_v13, 2  ;;  %v243_v17 = vrot.slane %v651_v13, 3  ;;  %v259_v24 = vrot.slane %v651_v13, 4 }
  0x7c   :  { %v92_v18 = vpop.xlane.xlu2 %91  ;;  %v86_v19 = vpop.xlane.xlu1 %85  ;;  %v275_v25 = vrot.slane %v651_v13, 5  ;;  %v291_v26 = vrot.slane %v651_v13, 6  ;;  %v307_v28 = vrot.slane %v651_v13, 7  ;;  %v326_v2 = vperm.slane %v651_v13, %v653_v14 }
  0x7d   :  { %v165_v20 = vrot.slane %v86_v19, 7  ;;  %v228_v21 = vrot.slane %v86_v19, 1  ;;  %v244_v22 = vrot.slane %v86_v19, 2  ;;  %v260_v23 = vrot.slane %v86_v19, 3 }
  0x7e   :  { %v276_v27 = vrot.slane %v86_v19, 4  ;;  %v292_v29 = vrot.slane %v86_v19, 5  ;;  %v308_v30 = vrot.slane %v86_v19, 6  ;;  %v168_v32 = vrot.slane %v92_v18, 6 }
  0x7f   :  { %v167_v31 = vsel %vm166_vm7, %v165_v20, %v651_v13  ;;  %v212_v33 = vsel %vm166_vm7, %v86_v19, %v211_v15  ;;  %v213_v34 = vrot.slane %v92_v18, 7  ;;  %v229_v35 = vsel %vm166_vm7, %v228_v21, %v227_v16 }
  0x80   :  { %v230_v36 = vsel %vm169_vm8, %v92_v18, %v229_v35  ;;  %v245_v37 = vsel %vm166_vm7, %v244_v22, %v243_v17  ;;  %v246_v38 = vrot.slane %v92_v18, 1  ;;  %v261_v39 = vsel %vm166_vm7, %v260_v23, %v259_v24 }
  0x81   :  { %v170_v41 = vsel %vm169_vm8, %v168_v32, %v167_v31  ;;  %v214_v42 = vsel %vm169_vm8, %v213_v34, %v212_v33  ;;  %v262_v43 = vrot.slane %v92_v18, 2  ;;  %v277_v44 = vsel %vm166_vm7, %v276_v27, %v275_v25 }
  0x82   :  { %v83_v40 = vpop.xlane.xlu0 %82  ;;  %v247_v46 = vsel %vm169_vm8, %v246_v38, %v245_v37  ;;  %v278_v47 = vrot.slane %v92_v18, 3  ;;  %v294_v48 = vrot.slane %v92_v18, 4  ;;  %v310_v52 = vrot.slane %v92_v18, 5 }
  0x83   :  { %v263_v51 = vsel %vm169_vm8, %v262_v43, %v261_v39  ;;  %v293_v53 = vsel %vm166_vm7, %v292_v29, %v291_v26  ;;  %v309_v54 = vsel %vm166_vm7, %v308_v30, %v307_v28  ;;  %v328_v60 = vperm.slane %v83_v40, %v673_v45 }
  0x84   :  { %v95_v49 = vpop.xlane.xlu2 %94  ;;  %v89_v50 = vpop.xlane.xlu1 %88  ;;  %v279_v57 = vsel %vm169_vm8, %v278_v47, %v277_v44  ;;  %v295_v58 = vsel %vm169_vm8, %v294_v48, %v293_v53  ;;  %v311_v59 = vsel %vm169_vm8, %v310_v52, %v309_v54  ;;  %v334_v3 = vperm.slane %v92_v18, %v653_v14 }
  0x85   :  { %v197_v55 = vrot.slane %v95_v49, 6  ;;  %v195_v56 = vrot.slane %v89_v50, 7  ;;  %v335_v62 = vperm.slane %v95_v49, %v673_v45  ;;  %v332_v63 = vperm.slane %v89_v50, %v673_v45 }
  0x86   :  { %v331_v4 = vperm.slane %v86_v19, %v653_v14  ;;  %v330_v6 = vsel %vm329_vm9, %v328_v60, %v326_v2 }
  0x87   :  { %v196_v61 = vsel %vm166_vm7, %v195_v56, %v83_v40  ;;  %v336_v10 = vsel %vm329_vm9, %v335_v62, %v334_v3 }
  0x88   :  { %v198_v1 = vsel %vm169_vm8, %v197_v55, %v196_v61  ;;  %v333_v11 = vsel %vm329_vm9, %v332_v63, %v331_v4 }
  0x8a   :  { %v98_v5 = vpop.xlane.xlu0 %97 }
  0x8b   :  { %v171_v8 = vrot.slane %v98_v5, 5  ;;  %v215_v9 = vrot.slane %v98_v5, 6  ;;  %v231_v0 = vrot.slane %v98_v5, 7  ;;  %v248_v13 = vsel %vm172_vm10, %v98_v5, %v247_v46 }
  0x8c   :  { %v694_v12 = vpop.xlane.xlu2 %103  ;;  %v101_v15 = vpop.xlane.xlu1 %100  ;;  %v264_v16 = vrot.slane %v98_v5, 1  ;;  %v280_v19 = vrot.slane %v98_v5, 2  ;;  %v296_v20 = vrot.slane %v98_v5, 3  ;;  %v337_v37 = vperm.slane %v98_v5, %v653_v14 }
  0x8d   :  { %v199_v17 = vrot.slane %v101_v15, 5  ;;  %v173_v18 = vsel %vm172_vm10, %v171_v8, %v170_v41  ;;  %v174_v21 = vrot.slane %v694_v12, 4  ;;  %v216_v22 = vsel %vm172_vm10, %v215_v9, %v214_v42 }
  0x8e   :  { %v217_v23 = vrot.slane %v694_v12, 5  ;;  %v232_v24 = vsel %vm172_vm10, %v231_v0, %v230_v36  ;;  %v338_v26 = vperm.slane %v101_v15, %v673_v45  ;;  %v233_v27 = vrot.slane %v694_v12, 6 }
  0x8f   :  { %v200_v25 = vsel %vm172_vm10, %v199_v17, %v198_v1  ;;  %v249_v28 = vrot.slane %v694_v12, 7  ;;  %v340_v29 = vperm.slane %v694_v12, %v653_v14  ;;  %v176_v30 = vsel %vm175_vm11, %v174_v21, %v173_v18 }
  0x90   :  { %v218_v31 = vsel %vm175_vm11, %v217_v23, %v216_v22  ;;  %v265_v32 = vsel %vm172_vm10, %v264_v16, %v263_v51  ;;  %v234_v33 = vsel %vm175_vm11, %v233_v27, %v232_v24  ;;  %v281_v36 = vsel %vm172_vm10, %v280_v19, %v279_v57 }
  0x91   :  { %v250_v34 = vsel %vm175_vm11, %v249_v28, %v248_v13  ;;  %v266_v35 = vsel %vm175_vm11, %v694_v12, %v265_v32  ;;  %v282_v39 = vrot.slane %v694_v12, 1  ;;  %v298_v40 = vrot.slane %v694_v12, 2 }
  0x92   :  { %v107_v38 = vpop.xlane.xlu0 %106  ;;  %v312_v41 = vrot.slane %v98_v5, 4  ;;  %v352_v42 = vsel %vm166_vm7, %v333_v11, %v330_v6  ;;  %v297_v46 = vsel %vm172_vm10, %v296_v20, %v295_v58  ;;  %v339_v47 = vsel %vm329_vm9, %v338_v26, %v337_v37 }
  0x93   :  { %v201_v43 = vrot.slane %v107_v38, 4  ;;  %v341_v44 = vperm.slane %v107_v38, %v673_v45  ;;  %v283_v50 = vsel %vm175_vm11, %v282_v39, %v281_v36  ;;  %v727_v51 = vsel %vm175_vm11, %v298_v40, %v297_v46 }
  0x94   :  { %v113_v48 = vpop.xlane.xlu2 %112  ;;  %v723_v49 = vpop.xlane.xlu1 %109  ;;  %v313_v52 = vsel %vm172_vm10, %v312_v41, %v311_v59  ;;  %v314_v56 = vrot.slane %v694_v12, 3  ;;  %v353_v62 = vsel %vm169_vm8, %v336_v10, %v352_v42 }
  0x95   :  { %v202_v53 = vsel %vm175_vm11, %v201_v43, %v200_v25  ;;  %v342_v54 = vsel %vm329_vm9, %v341_v44, %v340_v29  ;;  %v203_v55 = vrot.slane %v113_v48, 3  ;;  %v344_v57 = vperm.slane %v113_v48, %v673_v45 }
  0x96   :  { %v343_v58 = vperm.slane %v723_v49, %v653_v14  ;;  %v177_v60 = vrot.slane %v723_v49, 3  ;;  %v219_v61 = vrot.slane %v723_v49, 4  ;;  %v354_v63 = vsel %vm172_vm10, %v339_v47, %v353_v62 }
  0x97   :  { %v204_v59 = vsel %vm178_vm12, %v203_v55, %v202_v53  ;;  %v235_v3 = vrot.slane %v723_v49, 5  ;;  %v355_v4 = vsel %vm175_vm11, %v342_v54, %v354_v63  ;;  %v251_v5 = vrot.slane %v723_v49, 6 }
  0x98   :  { %v179_v1 = vsel %vm178_vm12, %v177_v60, %v176_v30  ;;  %v220_v2 = vsel %vm178_vm12, %v219_v61, %v218_v31  ;;  %v267_v6 = vrot.slane %v723_v49, 7  ;;  %v345_v9 = vsel %vm329_vm9, %v344_v57, %v343_v58 }
  0x99   :  { %v236_v0 = vsel %vm178_vm12, %v235_v3, %v234_v33  ;;  %v284_v10 = vsel %vm178_vm12, %v723_v49, %v283_v50  ;;  %v315_v11 = vsel %vm175_vm11, %v314_v56, %v313_v52  ;;  %v300_v16 = vrot.slane %v723_v49, 1 }
  0x9a   :  { %v116_v8 = vpop.xlane.xlu0 %115  ;;  %v252_v20 = vsel %vm178_vm12, %v251_v5, %v250_v34  ;;  %v268_v22 = vsel %vm178_vm12, %v267_v6, %v266_v35  ;;  %v356_v44 = vsel %vm178_vm12, %v345_v9, %v355_v4  ;;  %v316_v56 = vrot.slane %v723_v49, 2 }
  0x9b   :  { %v180_v12 = vrot.slane %v116_v8, 2  ;;  %v221_v15 = vrot.slane %v116_v8, 3  ;;  %v237_v13 = vrot.slane %v116_v8, 4  ;;  %v346_v19 = vperm.slane %v116_v8, %v653_v14 }
  0x9c   :  { %v122_v17 = vpop.xlane.xlu2 %121  ;;  %v119_v18 = vpop.xlane.xlu1 %118  ;;  %v253_v21 = vrot.slane %v116_v8, 5  ;;  %v269_v26 = vrot.slane %v116_v8, 6  ;;  %v285_v42 = vrot.slane %v116_v8, 7  ;;  %v301_v55 = vsel %vm178_vm12, %v300_v16, %v727_v51 }
  0x9d   :  { %v205_v23 = vrot.slane %v119_v18, 2  ;;  %v347_v24 = vperm.slane %v119_v18, %v673_v45  ;;  %v182_v25 = vsel %vm181_vm13, %v180_v12, %v179_v1  ;;  %v183_v27 = vrot.slane %v122_v17, 1 }
  0x9e   :  { %v222_v28 = vsel %vm181_vm13, %v221_v15, %v220_v2  ;;  %v223_v29 = vrot.slane %v122_v17, 2  ;;  %v238_v30 = vsel %vm181_vm13, %v237_v13, %v236_v0  ;;  %v349_v32 = vperm.slane %v122_v17, %v653_v14 }
  0x9f   :  { %v206_v31 = vsel %vm181_vm13, %v205_v23, %v204_v59  ;;  %v239_v33 = vrot.slane %v122_v17, 3  ;;  %v254_v34 = vsel %vm181_vm13, %v253_v21, %v252_v20  ;;  %v348_v35 = vsel %vm329_vm9, %v347_v24, %v346_v19 }
  0xa0   :  { %v185_v36 = vsel %vm184_vm14, %v183_v27, %v182_v25  ;;  %v224_v37 = vsel %vm184_vm14, %v223_v29, %v222_v28  ;;  %v255_v38 = vrot.slane %v122_v17, 4  ;;  %v270_v40 = vsel %vm181_vm13, %v269_v26, %v268_v22 }
  0xa1   :  { %v240_v39 = vsel %vm184_vm14, %v239_v33, %v238_v30  ;;  %v271_v41 = vrot.slane %v122_v17, 5  ;;  %v287_v46 = vrot.slane %v122_v17, 6  ;;  %v286_v52 = vsel %vm181_vm13, %v285_v42, %v284_v10 }
  0xa2   :  { %v125_v43 = vpop.xlane.xlu0 %124  ;;  %v256_v14 = vsel %vm184_vm14, %v255_v38, %v254_v34  ;;  %v357_v53 = vsel %vm181_vm13, %v348_v35, %v356_v44  ;;  %v303_v60 = vrot.slane %v122_v17, 7  ;;  %v302_v59 = vsel %vm181_vm13, %v116_v8, %v301_v55 }
  0xa3   :  { %v207_v47 = vrot.slane %v125_v43, 1  ;;  %v350_v48 = vperm.slane %v125_v43, %v673_v45  ;;  %v272_v50 = vsel %vm184_vm14, %v271_v41, %v270_v40  ;;  %v288_v54 = vsel %vm184_vm14, %v287_v46, %v286_v52 }
  0xa4   :  { %v318_v45 = vrot.slane %v116_v8, 1  ;;  %v317_v63 = vsel %vm178_vm12, %v316_v56, %v315_v11  ;;  %v304_v51 = vsel %vm184_vm14, %v303_v60, %v302_v59  ;;  %v394_v2 = vpop.xlane.xlu2 %393  ;;  %v377_v3 = vpop.xlane.xlu1 %376 }
  0xa5   :  { %v779_v57 = vsel %vm184_vm14, %v207_v47, %v206_v31  ;;  %v351_v58 = vsel %vm329_vm9, %v350_v48, %v349_v32  ;;  %515 = vrsqrt.f32 %v377_v3  ;;  %v388_v32 = vand.u32 2147483648, %v377_v3 }
  0xa6   :  { %v358_v61 = vsel %vm184_vm14, %v351_v58, %v357_v53  ;;  %v319_v49 = vsel %vm181_vm13, %v318_v45, %v317_v63  ;;  %517 = vrsqrt.f32 %v394_v2  ;;  %v405_v33 = vand.u32 2147483648, %v394_v2 }
  0xa7   :  { %v360_v62 = vsel %vm76_vm0, %v358_v61, 0.0  ;;  %v320_v1 = vsel %vm184_vm14, %v122_v17, %v319_v49  ;;  %vm792_vm0 = vmand %vm127_vm15, %vm128_vm1  ;;  %vm385_vm1 = vcmp.eq.f32.partialorder %v377_v3, inf }
  0xa8   :  { %361 = vadd.xlane.f32.xlu0 %v360_v62 }
  0xab   :  { %v516_v19 = vpop.eup %515 }
  0xac   :  { %v152_v6 = vpop.permute.xlu2 %151  ;;  %v518_v20 = vpop.eup %517  ;;  %v379_v21 = vmul.f32 %v516_v19, %v377_v3 }
  0xad   :  { %vm153_vm8 = vcmp.ne.s32.totalorder %v152_v6, 0  ;;  %v396_v22 = vmul.f32 %v518_v20, %v394_v2 }
  0xae   :  { %vm154_vm9 = vmand %vm130_vm2, %vm153_vm8  ;;  %v380_v23 = vmul.f32 %v516_v19, %v379_v21 }
  0xaf   :  { %vm155_vm11 = vmand %vm792_vm0, %vm153_vm8  ;;  %v397_v24 = vmul.f32 %v518_v20, %v396_v22 }
  0xb0   :  { %vm816_vm15 = vmand %vm126_vm3, %vm153_vm8  ;;  %v381_v25 = vmul.f32 0.5, %v380_v23  ;;  %vm424_vm8 = vcmask 7168  }
  0xb1   :  { %v398_v7 = vmul.f32 0.5, %v397_v24 }
  0xb2   :  { %v382_v26 = vsub.f32 1.5, %v381_v25 }
  0xb3   :  { %v399_v27 = vsub.f32 1.5, %v398_v7 }
  0xb4   :  { %v383_v28 = vmul.f32 %v516_v19, %v382_v26 }
  0xb5   :  { %v138_v5 = vpop.permute.xlu0 %137  ;;  %v400_v29 = vmul.f32 %v518_v20, %v399_v27 }
  0xb6   :  { %vm139_vm4 = vcmp.ne.s32.totalorder %v138_v5, 0  ;;  %v384_v30 = vmul.f32 %v383_v28, %v377_v3 }
  0xb7   :  { %vm140_vm5 = vmand %vm130_vm2, %vm139_vm4  ;;  %v401_v31 = vmul.f32 %v400_v29, %v394_v2 }
  0xb8   :  { %vm141_vm6 = vmand %vm792_vm0, %vm139_vm4  ;;  %v210_v8 = vsel %vm140_vm5, %v185_v36, %v779_v57  ;;  %v386_v34 = vsel %vm385_vm1, %v377_v3, %v384_v30 }
  0xb9   :  { %vm142_vm7 = vmand %vm126_vm3, %vm139_vm4  ;;  %v226_v9 = vsel %vm141_vm6, %v224_v37, %v210_v8 }
  0xba   :  { %v242_v0 = vsel %vm142_vm7, %v240_v39, %v226_v9 }
  0xbc   :  { %v145_v10 = vpop.permute.xlu1 %144 }
  0xbd   :  { %vm146_vm10 = vcmp.ne.s32.totalorder %v145_v10, 0 }
  0xbe   :  { %vm147_vm12 = vmand %vm130_vm2, %vm146_vm10  ;;  %vm402_vm2 = vcmp.eq.f32.partialorder %v394_v2, inf }
  0xbf   :  { %vm148_vm13 = vmand %vm792_vm0, %vm146_vm10  ;;  %v258_v11 = vsel %vm147_vm12, %v256_v14, %v242_v0  ;;  %vm387_vm0 = vcmp.eq.f32.partialorder %v377_v3, 0.0  ;;  %v403_v35 = vsel %vm402_vm2, %v394_v2, %v401_v31 }
  0xc0   :  { %vm149_vm14 = vmand %vm126_vm3, %vm146_vm10  ;;  %v274_v12 = vsel %vm148_vm13, %v272_v50, %v258_v11  ;;  %vm404_vm3 = vcmp.eq.f32.partialorder %v394_v2, 0.0  ;;  %v389_v36 = vsel %vm387_vm0, %v388_v32, %v386_v34  ;;  %vm428_vm10 = vcmask 23552  }
  0xc1   :  { %v290_v15 = vsel %vm149_vm14, %v288_v54, %v274_v12  ;;  %v406_v37 = vsel %vm404_vm3, %v405_v33, %v403_v35  ;;  %v390_v38 = vmax.f32 %v389_v36, 1e-08  ;;  %vm465_vm13 = vcmask 31744  }
  0xc2   :  { %v306_v16 = vsel %vm154_vm9, %v304_v51, %v290_v15  ;;  %v407_v39 = vmax.f32 %v406_v37, 1e-08  ;;  %vm426_vm9 = vcmask 15360  }
  0xc3   :  { %v322_v17 = vsel %vm155_vm11, %v320_v1, %v306_v16 }
  0xc4   :  { %v323_v18 = vsel %vm816_vm15, %v779_v57, %v322_v17  ;;  %v408_v40 = vmul.f32 %v407_v39, %v390_v38  ;;  %vm496_vm15 = vcmask 39936  }
  0xc5   :  { %v504_v52 = vadd.f32 -1.0, %v323_v18 }
  0xc6   :  { %519 = vrcp.f32 %v408_v40  ;;  %vm414_vm4 = vweird.f32 %v408_v40  ;;  %v420_v46 = vand.u32 2147483648, %v408_v40  ;;  %v418_v48 = vand.u32 2147483647, %v408_v40 }
  0xc7   :  { %v371_v57 = vmul.f32 0.5, %v504_v52 }
  0xc8   :  { %v421_v53 = vor.u32 1.1754944e-38, %v420_v46  ;;  %vm419_vm7 = vcmp.eq.f32.partialorder %v418_v48, 8.507059e+37 }
  0xcc   :  { %v520_v41 = vpop.eup %519 }
  0xcd   :  { %v410_v42 = vmul.f32 %v520_v41, %v408_v40  ;;  %vm415_vm5 = vweird.f32 %v520_v41 }
  0xce   :  { %vm416_vm6 = vmor %vm414_vm4, %vm415_vm5 }
  0xcf   :  { %v411_v43 = vsub.f32 1.0, %v410_v42 }
  0xd1   :  { %v412_v44 = vmul.f32 %v520_v41, %v411_v43 }
  0xd3   :  { %v413_v47 = vadd.f32 %v520_v41, %v412_v44 }
  0xd5   :  { %v417_v54 = vsel %vm416_vm6, %v520_v41, %v413_v47 }
  0xd6   :  { %v422_v58 = vsel %vm419_vm7, %v421_v53, %v417_v54 }
  0xe5   :  { %v367_v14 = vpop.xlane.xlu2 %366 }
  0xe6   :  { %v503_v50 = vadd.f32 -1.0, %v367_v14  ;;  %v423_v62 = vmul.f32 %v422_v58, %v367_v14 }
  0xe8   :  { %v369_v55 = vmul.f32 0.5, %v503_v50 }
  0xea   :  { %v425_v45 = vsel %vm424_vm8, %v369_v55, %v371_v57 }
  0xeb   :  { %v427_v63 = vsel %vm426_vm9, %v425_v45, %v423_v62 }
 0x11b   :  { %v362_v56 = vpop.xlane.xlu0 %361 }
 0x11c   :  { %v363_v60 = vmul.f32 0.11111111, %v362_v56 }
 0x11e   :  { %v505_v61 = vadd.f32 -1.0, %v363_v60 }
 0x120   :  { %v373_v59 = vmul.f32 0.5, %v505_v61 }
 0x122   :  { %v429_v51 = vsel %vm428_vm10, %v427_v63, %v373_v59 }
 0x123   :  { %v506_v49 = vclamps-f32 %v429_v51, 0.9999999 }
 0x125   :  { %v432_v1 = vand.u32 2147483647, %v506_v49  ;;  %vm462_vm14 = vcmp.lt.f32.partialorder %v506_v49, 0.0 }
 0x127   :  { %v433_v2 = vmul.f32 -0.0012624911, %v432_v1  ;;  %v447_v3 = vsub.f32 1.0, %v432_v1 }
 0x129   :  { %v434_v4 = vadd.f32 0.00667009, %v433_v2  ;;  %v448_v5 = vmax.f32 %v447_v3, 0.0 }
 0x12b   :  { %v435_v6 = vmul.f32 %v434_v4, %v432_v1  ;;  %521 = vrsqrt.f32 %v448_v5  ;;  %vm456_vm11 = vcmp.eq.f32.partialorder %v448_v5, inf  ;;  %v459_v7 = vand.u32 2147483648, %v448_v5 }
 0x12c   :  { %vm458_vm12 = vcmp.eq.f32.partialorder %v448_v5, 0.0 }
 0x12d   :  { %v507_v8 = vadd.f32 -0.017088126, %v435_v6 }
 0x12f   :  { %v437_v9 = vmul.f32 %v507_v8, %v432_v1 }
 0x131   :  { %v522_v0 = vpop.eup %521  ;;  %v438_v10 = vadd.f32 0.03089188, %v437_v9 }
 0x132   :  { %v450_v11 = vmul.f32 %v522_v0, %v448_v5 }
 0x133   :  { %v439_v12 = vmul.f32 %v438_v10, %v432_v1 }
 0x134   :  { %v451_v15 = vmul.f32 %v522_v0, %v450_v11 }
 0x135   :  { %v508_v13 = vadd.f32 -0.050174303, %v439_v12 }
 0x136   :  { %v452_v16 = vmul.f32 0.5, %v451_v15 }
 0x137   :  { %v441_v17 = vmul.f32 %v508_v13, %v432_v1 }
 0x138   :  { %v453_v18 = vsub.f32 1.5, %v452_v16 }
 0x139   :  { %v442_v19 = vadd.f32 0.08897899, %v441_v17 }
 0x13a   :  { %v454_v20 = vmul.f32 %v522_v0, %v453_v18 }
 0x13b   :  { %v443_v21 = vmul.f32 %v442_v19, %v432_v1 }
 0x13c   :  { %v455_v22 = vmul.f32 %v454_v20, %v448_v5 }
 0x13d   :  { %v509_v23 = vadd.f32 -0.2145988, %v443_v21 }
 0x13e   :  { %v457_v25 = vsel %vm456_vm11, %v448_v5, %v455_v22 }
 0x13f   :  { %v445_v24 = vmul.f32 %v509_v23, %v432_v1  ;;  %v460_v27 = vsel %vm458_vm12, %v459_v7, %v457_v25 }
 0x141   :  { %v446_v26 = vadd.f32 1.5707963, %v445_v24 }
 0x143   :  { %v461_v28 = vmul.f32 %v460_v27, %v446_v26 }
 0x145   :  { %v463_v29 = vsub.f32 3.1415927, %v461_v28 }
 0x147   :  { %v464_v30 = vsel %vm462_vm14, %v463_v29, %v461_v28 }
 0x148   :  { %v466_v31 = vsel %vm465_vm13, %v464_v30, 0.0 }
 0x149   :  { %v467_v32 = vrot.slane %v466_v31, 4 }
 0x14b   :  { %v468_v33 = vadd.f32 %v467_v32, %v466_v31 }
 0x14d   :  { %v469_v34 = vrot.slane %v468_v33, 2 }
 0x14f   :  { %v470_v35 = vadd.f32 %v469_v34, %v468_v33 }
 0x151   :  { %v471_v36 = vrot.slane %v470_v35, 1 }
 0x153   :  { %v472_v37 = vadd.f32 %v471_v36, %v470_v35 }
 0x155   :  { %v473_v38 = vmul.f32 0.125, %v472_v37 }
 0x157   :  { %v475_v39 = vmul.f32 0.4, %v473_v38  ;;  %v481_v40 = vmul.f32 0.1, %v473_v38  ;;  %v474_v44 = vmul.f32 0.6, %v473_v38 }
 0x159   :  { %477 = vrot.lane.b32.xlu1 %v475_v39, %s525_s2 }
 0x161   :  { %483 = vrot.lane.b32.xlu1 %v481_v40, %s526_s24 }
 0x169   :  { %487 = vrot.lane.b32.xlu1 %v481_v40, %s527_s25 }
 0x171   :  { %492 = vrot.lane.b32.xlu1 %v473_v38, %s524_s23 }
 0x1cb   :  { %v478_v41 = vpop.permute.xlu1 %477 }
 0x1cc   :  { %v480_v14 = vadd.f32 %v478_v41, %v474_v44 }
 0x1d3   :  { %v484_v42 = vpop.permute.xlu1 %483 }
 0x1d4   :  { %v486_v46 = vadd.f32 %v484_v42, %v480_v14 }
 0x1db   :  { %v488_v43 = vpop.permute.xlu1 %487 }
 0x1dc   :  { %v490_v47 = vadd.f32 %v488_v43, %v486_v46 }
 0x1e3   :  { %v493_v48 = vpop.permute.xlu1 %492 }
 0x1e4   :  { %v495_v50 = vsel %vm424_vm8, %v490_v47, %v493_v48 }
 0x1e5   :  { %v497_v52 = vsel %vm496_vm15, %v495_v50, 0.0 }
 0x1e6   :  { %498 = vst [vmem:[%s833_s4] sm:$0x1] %v497_v52 }

</bundles_post_ra>
